<compile_context>
chip_gen: v6e
topology: v6e:2x2x1
jax: 0.10.0
libtpu: 0.0.40
codegen_flags: <defaults>
</compile_context>

<pallas_src>
import functools

import jax
import jax.numpy as jnp
from jax.experimental import pallas as pl
from jax.experimental.pallas import tpu as pltpu

BN_EPS = 1e-3            # nn.BatchNorm1d(eps=0.001)
LANE = 128
SUBLANE = 8
_K_ALIGN = 1024          # max stage-1 K tile; W1 is zero-padded once to this granularity


def _round_up(x, m):
    return (x + m - 1) // m * m


def _cdiv(a, b):
    return (a + b - 1) // b


def _k_pad(d_nb):
    """Padded K extent of W1 (done once at prepare time)."""
    return _round_up(d_nb, LANE) if d_nb <= _K_ALIGN else _round_up(d_nb, _K_ALIGN)


def _pick_vmem_limit():
    """Generation-aware scoped-VMEM limit (v7x: 64 MiB phys, v5e/v6e: 128 MiB)."""
    default = 32 * 1024 * 1024
    try:
        info = pltpu.get_tpu_info()
    except Exception:
        return default
    phys = None
    for name in ("vmem_capacity_bytes", "vmem_bytes", "vmem_size_bytes"):
        phys = getattr(info, name, None)
        if phys:
            break
    if not phys:
        return default
    return int(min(phys * 3 // 4, 96 * 1024 * 1024))


# --------------------------------------------------------------- stage 1 ----
# Pre-BN activations of the two first linear layers, fused into one lane-dense
# output slab [y1 | yg1].  Grid = (batch tiles, K tiles of neighborx @ W1).
def _stage1_kernel(d_nb, h, nb_ref, g_ref, w1_ref, wg1_ref, out_ref):
    k = pl.program_id(1)

    @pl.when(k == 0)
    def _():
        # Linear biases dropped: constant per-feature offsets are a no-op under
        # the training-mode BatchNorm that immediately follows.
        out_ref[...] = jnp.zeros_like(out_ref)
        yg1 = jnp.dot(g_ref[...].astype(jnp.bfloat16), wg1_ref[...],
                      preferred_element_type=jnp.float32)
        out_ref[:, h:2 * h] = yg1

    # Zero the K-padding columns of the (possibly out-of-bounds) last neighborx
    # block so stale VMEM contents can never pollute the accumulation.
    tile_k = nb_ref.shape[1]
    col = k * tile_k + jax.lax.broadcasted_iota(jnp.int32, nb_ref.shape, 1)
    nb = jnp.where(col < d_nb, nb_ref[...], 0).astype(jnp.bfloat16)
    out_ref[:, :h] += jnp.dot(nb, w1_ref[...], preferred_element_type=jnp.float32)


# --------------------------------------------------------------- stage 2 ----
def _bn_relu(y, gamma, beta, inv_n):
    """Training-mode BatchNorm1d (biased full-batch stats, eps=1e-3) + ReLU.

    Two-pass (shifted) variance avoids E[x^2]-E[x]^2 cancellation.
    """
    mu = jnp.sum(y, axis=0, keepdims=True) * inv_n
    d = y - mu
    var = jnp.sum(d * d, axis=0, keepdims=True) * inv_n
    scale = gamma * jax.lax.rsqrt(var + BN_EPS)
    return jnp.maximum(d * scale + beta, 0.0)


def _stage2_kernel(h, var_eps,
                   slab_ref, eps_ref,
                   gm1_ref, bt1_ref, gmg1_ref, btg1_ref,
                   wg2_ref, gmg2_ref, btg2_ref,
                   wmvq_ref, wmvg_ref, bmv_ref,
                   out_ref):
    inv_n = 1.0 / slab_ref.shape[0]

    # encoder branch
    h1 = _bn_relu(slab_ref[:, :h], gm1_ref[...], bt1_ref[...], inv_n)
    # g_encoder branch: BN+ReLU, second Linear (bias dropped, BN-invariant), BN+ReLU
    hg1 = _bn_relu(slab_ref[:, h:2 * h], gmg1_ref[...], btg1_ref[...], inv_n)
    yg2 = jnp.dot(hg1.astype(jnp.bfloat16), wg2_ref[...],
                  preferred_element_type=jnp.float32)
    hg2 = _bn_relu(yg2, gmg2_ref[...], btg2_ref[...], inv_n)

    # fused mean|var heads: concat([h1, hg2], 1) @ [Wm | Wv]
    #   == h1 @ Wmv_q + hg2 @ Wmv_g   (no lane-dim concat; 2 matmuls not 4)
    out = (jnp.dot(h1.astype(jnp.bfloat16), wmvq_ref[...],
                   preferred_element_type=jnp.float32)
           + jnp.dot(hg2.astype(jnp.bfloat16), wmvg_ref[...],
                     preferred_element_type=jnp.float32)
           + bmv_ref[...])
    p = out.shape[-1] // 2               # lane-padded latent width (multiple of 128)
    q_m = out[:, :p]
    q_v = jnp.exp(out[:, p:]) + var_eps
    latent = q_m + jnp.sqrt(q_v) * eps_ref[...]

    # single lane-dense output slab: [q_m | q_v | latent]
    out_ref[:, :p] = q_m
    out_ref[:, p:2 * p] = q_v
    out_ref[:, 2 * p:] = latent


# ------------------------------------------------------- param preparation --
def prepare_params(params):
    """One-time (per-model) weight preprocessing, hoisted out of the forward path:
    bf16 casts, K-padding of W1, and the fused lane-padded [mean | var] head."""
    w1 = jnp.asarray(params["w1"])
    d_nb, h = w1.shape
    d_pad = _k_pad(d_nb)
    w1_p = jnp.zeros((d_pad, h), jnp.bfloat16).at[:d_nb].set(w1.astype(jnp.bfloat16))
    wg1_p = jnp.asarray(params["wg1"]).astype(jnp.bfloat16)
    wg2_p = jnp.asarray(params["wg2"]).astype(jnp.bfloat16)

    wm = jnp.asarray(params["wm"], jnp.float32)
    wv = jnp.asarray(params["wv"], jnp.float32)
    bm = jnp.asarray(params["bm"], jnp.float32).reshape(1, -1)
    bv = jnp.asarray(params["bv"], jnp.float32).reshape(1, -1)
    n_out = wm.shape[1]
    p_out = _round_up(n_out, LANE)
    wmv_q = (jnp.zeros((h, 2 * p_out), jnp.float32)
             .at[:, :n_out].set(wm[:h]).at[:, p_out:p_out + n_out].set(wv[:h])
             ).astype(jnp.bfloat16)
    wmv_g = (jnp.zeros((h, 2 * p_out), jnp.float32)
             .at[:, :n_out].set(wm[h:]).at[:, p_out:p_out + n_out].set(wv[h:])
             ).astype(jnp.bfloat16)
    bmv = (jnp.zeros((1, 2 * p_out), jnp.float32)
           .at[:, :n_out].set(bm).at[:, p_out:p_out + n_out].set(bv))

    f32 = lambda a: jnp.asarray(a, jnp.float32).reshape(1, -1)
    # NOTE: b1 / bg1 / bg2 are intentionally dropped (BN-invariant constants).
    return dict(
        w1=w1_p, wg1=wg1_p, wg2=wg2_p, wmv_q=wmv_q, wmv_g=wmv_g, bmv=bmv,
        gamma1=f32(params["gamma1"]), beta1=f32(params["beta1"]),
        gammag1=f32(params["gammag1"]), betag1=f32(params["betag1"]),
        gammag2=f32(params["gammag2"]), betag2=f32(params["betag2"]),
        d_nb=d_nb, d_pad=d_pad, n_hidden=h, n_out=n_out, p_out=p_out)


# --------------------------------------------------------------- wrapper ----
def my_encoder_forward(x, neighborx, prep, eps_noise, geneset_len, var_eps=1e-4):
    assert geneset_len > 0, "kernel implements the geneset_len != 0 path"
    # TODO(synk): neighborx is None / geneset_len == 0 branches are not implemented.
    b = x.shape[0]
    nb = neighborx.reshape(b, -1)            # read as-is, bf16 cast happens in-kernel
    g = x[:, -geneset_len:]

    h = prep["n_hidden"]
    n_out = prep["n_out"]
    p_out = prep["p_out"]
    d_nb = nb.shape[1]
    assert d_nb == prep["d_nb"], "neighborx width does not match prepared W1"
    d_pad = prep["d_pad"]
    gs = g.shape[1]
    w_slab = _round_up(2 * h, LANE)
    vmem_limit = _pick_vmem_limit()

    # ---- stage-1 tiling ------------------------------------------------
    tile_b = min(512, _round_up(b, SUBLANE))
    if _cdiv(b, tile_b) < 2 and b >= 2 * SUBLANE:
        # make sure the "parallel" batch axis spans both v7x TensorCores
        tile_b = _round_up(_cdiv(b, 2), SUBLANE)
    tile_k = min(_K_ALIGN, d_pad)

    nb_bytes = jnp.dtype(nb.dtype).itemsize
    g_bytes = jnp.dtype(g.dtype).itemsize

    def s1_vmem(tb, tk):
        # double-buffered blocks: nb, W1 (bf16), geneset slice, Wg1 (bf16), out slab
        return 2 * (tb * tk * nb_bytes + tk * h * 2 + tb * gs * g_bytes
                    + gs * h * 2 + tb * w_slab * 4)

    budget = int(0.7 * vmem_limit)
    while s1_vmem(tile_b, tile_k) > budget:
        new_tk = tile_k // 2
        if new_tk >= LANE and new_tk % LANE == 0 and d_pad % new_tk == 0:
            tile_k = new_tk
        elif tile_b > SUBLANE:
            tile_b = _round_up(tile_b // 2, SUBLANE)
        else:
            break
    # TODO(synk): for very large geneset_len the resident geneset block should be
    # K-tiled as well; here it is only budgeted against VMEM.

    grid = (_cdiv(b, tile_b), _cdiv(d_nb, tile_k))

    y_slab = pl.pallas_call(
        functools.partial(_stage1_kernel, d_nb, h),
        out_shape=jax.ShapeDtypeStruct((b, w_slab), jnp.float32),
        grid_spec=pltpu.PrefetchScalarGridSpec(
            num_scalar_prefetch=0,
            grid=grid,
            in_specs=[
                pl.BlockSpec((tile_b, tile_k), lambda i, k: (i, k)),   # neighborx (as-is)
                pl.BlockSpec((tile_b, gs), lambda i, k: (i, 0)),       # geneset slice
                pl.BlockSpec((tile_k, h), lambda i, k: (k, 0)),        # W1 (bf16, K-padded)
                pl.BlockSpec((gs, h), lambda i, k: (0, 0)),            # Wg1 (bf16, resident)
            ],
            out_specs=pl.BlockSpec((tile_b, w_slab), lambda i, k: (i, 0)),
        ),
        compiler_params=pltpu.CompilerParams(
            dimension_semantics=("parallel", "arbitrary"),
            vmem_limit_bytes=vmem_limit),
    )(nb, g, prep["w1"], prep["wg1"])

    # ---- stage 2: exact full-batch BN, second g layer, heads, sampling ------
    eps_p = jnp.zeros((b, p_out), jnp.float32).at[:, :n_out].set(
        eps_noise.astype(jnp.float32))

    stage2_inputs = (
        y_slab, eps_p,
        prep["gamma1"], prep["beta1"], prep["gammag1"], prep["betag1"],
        prep["wg2"], prep["gammag2"], prep["betag2"],
        prep["wmv_q"], prep["wmv_g"], prep["bmv"])
    # TODO(synk): stage 2 keeps the whole batch resident in VMEM for exact
    # full-batch BatchNorm stats; batches beyond ~10-30k rows would need a
    # tiled multi-pass BN reduction instead.
    slab = pl.pallas_call(
        functools.partial(_stage2_kernel, h, var_eps),
        out_shape=jax.ShapeDtypeStruct((b, 3 * p_out), jnp.float32),
        in_specs=[pl.BlockSpec(memory_space=pltpu.MemorySpace.VMEM)
                  for _ in stage2_inputs],
        out_specs=pl.BlockSpec(memory_space=pltpu.MemorySpace.VMEM),
        compiler_params=pltpu.CompilerParams(vmem_limit_bytes=vmem_limit),
    )(*stage2_inputs)

    q_m = slab[:, :n_out]
    q_v = slab[:, p_out:p_out + n_out]
    latent = slab[:, 2 * p_out:2 * p_out + n_out]
    return q_m, q_v, latent


# ------------------------------------------------------------------ demo ----
def init_params(key, geneset_len, n_input, n_output, n_hidden):
    """Deterministic synthetic parameters matching myEncoder.__init__ shapes."""
    d_nb = n_input - geneset_len
    ks = list(jax.random.split(key, 8))

    def lin(k, fan_in, fan_out):
        kw, kb = jax.random.split(k)
        bound = float(fan_in) ** -0.5
        w = jax.random.uniform(kw, (fan_in, fan_out), jnp.float32, -bound, bound)
        b = jax.random.uniform(kb, (1, fan_out), jnp.float32, -bound, bound)
        return w, b

    def bn(k, n):
        kg, kb2 = jax.random.split(k)
        gamma = 1.0 + 0.1 * jax.random.normal(kg, (1, n), jnp.float32)
        beta = 0.1 * jax.random.normal(kb2, (1, n), jnp.float32)
        return gamma, beta

    w1, b1 = lin(ks[0], d_nb, n_hidden)
    gamma1, beta1 = bn(ks[1], n_hidden)
    wg1, bg1 = lin(ks[2], geneset_len, n_hidden)
    gammag1, betag1 = bn(ks[3], n_hidden)
    wg2, bg2 = lin(ks[4], n_hidden, n_hidden)
    gammag2, betag2 = bn(ks[5], n_hidden)
    wm, bm = lin(ks[6], 2 * n_hidden, n_output)   # mean_encoder: Linear(2h, n_out)
    wv, bv = lin(ks[7], 2 * n_hidden, n_output)   # var_encoder:  Linear(2h, n_out)

    return dict(w1=w1, b1=b1, gamma1=gamma1, beta1=beta1,
                wg1=wg1, bg1=bg1, gammag1=gammag1, betag1=betag1,
                wg2=wg2, bg2=bg2, gammag2=gammag2, betag2=betag2,
                wm=wm, bm=bm, wv=wv, bv=bv)


def _reference_forward(x, neighborx, params, eps_noise, geneset_len, var_eps=1e-4):
    """Pure-JAX f32 reference of the torch forward (training-mode BN, dropout=id)."""
    def bn_relu(y, gamma, beta):
        mu = y.mean(0, keepdims=True)
        var = ((y - mu) ** 2).mean(0, keepdims=True)
        return jax.nn.relu((y - mu) / jnp.sqrt(var + BN_EPS) * gamma + beta)

    q = bn_relu(neighborx @ params["w1"] + params["b1"],
                params["gamma1"], params["beta1"])
    g = bn_relu(x[:, -geneset_len:] @ params["wg1"] + params["bg1"],
                params["gammag1"], params["betag1"])
    g = bn_relu(g @ params["wg2"] + params["bg2"],
                params["gammag2"], params["betag2"])
    h = jnp.concatenate([q, g], axis=1)
    q_m = h @ params["wm"] + params["bm"]
    q_v = jnp.exp(h @ params["wv"] + params["bv"]) + var_eps
    latent = q_m + jnp.sqrt(q_v) * eps_noise
    return q_m, q_v, latent


if __name__ == "__main__":
    # Small, module-consistent shapes.
    b = 8
    geneset_len = 16
    n_input = 48          # encoder input dim = n_input - geneset_len = 32
    n_hidden = 32
    n_output = 8

    key = jax.random.PRNGKey(0)
    kx, knb, keps, kparam = jax.random.split(key, 4)
    x = jax.random.normal(kx, (b, n_input), jnp.float32)
    neighborx = jax.random.normal(knb, (b, n_input - geneset_len), jnp.float32)
    eps_noise = jax.random.normal(keps, (b, n_output), jnp.float32)
    params = init_params(kparam, geneset_len, n_input, n_output, n_hidden)

    prep = prepare_params(params)   # one-time weight preprocessing (hoisted)
    q_m, q_v, latent = my_encoder_forward(
        x, neighborx, prep, eps_noise, geneset_len, var_eps=1e-4)
    jax.block_until_ready((q_m, q_v, latent))

    assert q_m.shape == (b, n_output)
    assert q_v.shape == (b, n_output)
    assert latent.shape == (b, n_output)
    assert bool(jnp.all(q_v > 0))
    assert bool(jnp.all(jnp.isfinite(q_m)))
    assert bool(jnp.all(jnp.isfinite(latent)))

    rm, rv, rl = _reference_forward(x, neighborx, params, eps_noise,
                                    geneset_len, var_eps=1e-4)
    assert bool(jnp.allclose(q_m, rm, atol=0.1, rtol=0.05))
    assert bool(jnp.allclose(q_v, rv, atol=0.1, rtol=0.05))
    assert bool(jnp.allclose(latent, rl, atol=0.1, rtol=0.05))
    print("KERNEL_OK")
</pallas_src>

<mosaic_0001>
module attributes {stable_mosaic.version = 11 : i64} {
  func.func @_stage1_kernel(%arg0: i32, %arg1: i32, %arg2: memref<8x128xf32, #tpu.memory_space<vmem>>, %arg3: memref<8x16xf32, #tpu.memory_space<vmem>>, %arg4: memref<128x32xbf16, #tpu.memory_space<vmem>>, %arg5: memref<16x32xbf16, #tpu.memory_space<vmem>>, %arg6: memref<8x128xf32, #tpu.memory_space<vmem>>) attributes {dimension_semantics = [#tpu.dimension_semantics<parallel>, #tpu.dimension_semantics<arbitrary>], iteration_bounds = array<i64: 1, 1>, scalar_prefetch = 0 : i64, scratch_operands = 0 : i64, tpu.core_type = #tpu.core_type<tc>, window_params = [{transform_indices = @transform_0, window_bounds = array<i64: 8, 128>}, {transform_indices = @transform_1, window_bounds = array<i64: 8, 16>}, {transform_indices = @transform_2, window_bounds = array<i64: 128, 32>}, {pipeline_mode = #tpu.pipeline_mode<synchronous>, transform_indices = @transform_3, window_bounds = array<i64: 16, 32>}, {transform_indices = @transform_4, window_bounds = array<i64: 8, 128>}]} {
    %c0_i32 = arith.constant 0 : i32
    %0 = arith.cmpi eq, %arg1, %c0_i32 : i32
    %1 = arith.extui %0 : i1 to i32
    %c0_i32_0 = arith.constant 0 : i32
    %2 = arith.cmpi ne, %1, %c0_i32_0 : i32
    scf.if %2 {
      %cst_9 = arith.constant 0.000000e+00 : f32
      %19 = vector.broadcast %cst_9 : f32 to vector<8x128xf32>
      %c0_10 = arith.constant 0 : index
      %c0_11 = arith.constant 0 : index
      %20 = vector.load %arg6[%c0_10, %c0_11] : memref<8x128xf32, #tpu.memory_space<vmem>>, vector<8x128xf32>
      tpu.vector_store %arg6[%c0_10, %c0_11], %19 {strides = array<i32>} : memref<8x128xf32, #tpu.memory_space<vmem>>, vector<8x128xf32>,
      %c0_12 = arith.constant 0 : index
      %c0_13 = arith.constant 0 : index
      %21 = vector.load %arg3[%c0_12, %c0_13] : memref<8x16xf32, #tpu.memory_space<vmem>>, vector<8x16xf32>
      %22 = arith.truncf %21 : vector<8x16xf32> to vector<8x16xbf16>
      %c0_14 = arith.constant 0 : index
      %c0_15 = arith.constant 0 : index
      %23 = vector.load %arg5[%c0_14, %c0_15] : memref<16x32xbf16, #tpu.memory_space<vmem>>, vector<16x32xbf16>
      %cst_16 = arith.constant dense<0.000000e+00> : vector<8x32xf32>
      %24 = tpu.matmul %22, %23, %cst_16 {dimension_numbers = #tpu.dot_dimension_numbers<[1], [0], [0], [1], [0, 0, 1, 1], [], []>} : vector<8x16xbf16>, vector<16x32xbf16>, vector<8x32xf32> -> vector<8x32xf32>
      %c0_17 = arith.constant 0 : index
      %c32 = arith.constant 32 : index
      %25 = vector.load %arg6[%c0_17, %c32] : memref<8x128xf32, #tpu.memory_space<vmem>>, vector<8x32xf32>
      tpu.vector_store %arg6[%c0_17, %c32], %24 {strides = array<i32>} : memref<8x128xf32, #tpu.memory_space<vmem>>, vector<8x32xf32>,
    } else {
    }
    %c128_i32 = arith.constant 128 : i32
    %3 = arith.muli %arg1, %c128_i32 : i32
    %4 = tpu.iota {dimensions = array<i32: 1>} : vector<8x128xi32>
    %5 = vector.broadcast %3 : i32 to vector<8x128xi32>
    %6 = arith.addi %5, %4 : vector<8x128xi32>
    %c32_i32 = arith.constant 32 : i32
    %7 = vector.broadcast %c32_i32 : i32 to vector<8x128xi32>
    %8 = arith.cmpi slt, %6, %7 : vector<8x128xi32>
    %c0 = arith.constant 0 : index
    %c0_1 = arith.constant 0 : index
    %9 = vector.load %arg2[%c0, %c0_1] : memref<8x128xf32, #tpu.memory_space<vmem>>, vector<8x128xf32>
    %c0_i32_2 = arith.constant 0 : i32
    %10 = arith.sitofp %c0_i32_2 : i32 to f32
    %11 = vector.broadcast %10 : f32 to vector<8x128xf32>
    %12 = arith.select %8, %9, %11 : vector<8x128xi1>, vector<8x128xf32>
    %13 = arith.truncf %12 : vector<8x128xf32> to vector<8x128xbf16>
    %c0_3 = arith.constant 0 : index
    %c0_4 = arith.constant 0 : index
    %14 = vector.load %arg6[%c0_3, %c0_4] : memref<8x128xf32, #tpu.memory_space<vmem>>, vector<8x32xf32>
    %c0_5 = arith.constant 0 : index
    %c0_6 = arith.constant 0 : index
    %15 = vector.load %arg4[%c0_5, %c0_6] : memref<128x32xbf16, #tpu.memory_space<vmem>>, vector<128x32xbf16>
    %cst = arith.constant dense<0.000000e+00> : vector<8x32xf32>
    %16 = tpu.matmul %13, %15, %cst {dimension_numbers = #tpu.dot_dimension_numbers<[1], [0], [0], [1], [0, 0, 1, 1], [], []>} : vector<8x128xbf16>, vector<128x32xbf16>, vector<8x32xf32> -> vector<8x32xf32>
    %17 = arith.addf %14, %16 : vector<8x32xf32>
    %c0_7 = arith.constant 0 : index
    %c0_8 = arith.constant 0 : index
    %18 = vector.load %arg6[%c0_7, %c0_8] : memref<8x128xf32, #tpu.memory_space<vmem>>, vector<8x32xf32>
    tpu.vector_store %arg6[%c0_7, %c0_8], %17 {strides = array<i32>} : memref<8x128xf32, #tpu.memory_space<vmem>>, vector<8x32xf32>,
    return
  }
  func.func @transform_0(%arg0: i32, %arg1: i32) -> (i32, i32) {
    %c0_i32 = arith.constant 0 : i32
    return %arg0, %arg1 : i32, i32
  }
  func.func @transform_1(%arg0: i32, %arg1: i32) -> (i32, i32) {
    %c0_i32 = arith.constant 0 : i32
    %c0_i32_0 = arith.constant 0 : i32
    return %arg0, %c0_i32 : i32, i32
  }
  func.func @transform_2(%arg0: i32, %arg1: i32) -> (i32, i32) {
    %c0_i32 = arith.constant 0 : i32
    %c0_i32_0 = arith.constant 0 : i32
    return %arg1, %c0_i32 : i32, i32
  }
  func.func @transform_3(%arg0: i32, %arg1: i32) -> (i32, i32) {
    %c0_i32 = arith.constant 0 : i32
    %c0_i32_0 = arith.constant 0 : i32
    %c0_i32_1 = arith.constant 0 : i32
    return %c0_i32, %c0_i32_0 : i32, i32
  }
  func.func @transform_4(%arg0: i32, %arg1: i32) -> (i32, i32) {
    %c0_i32 = arith.constant 0 : i32
    %c0_i32_0 = arith.constant 0 : i32
    return %arg0, %c0_i32 : i32, i32
  }
}

</mosaic_0001>

<bundles_post_ra>
// kernel: tpu_custom_call.1
= control target key start
LH: loop header
LB: loop body
LE: loop exit
PB: predicated region body
PF: predicated region fallthrough
CT: control target
= control target key end

     0   :  { %v300_v1 = vmov 0.0   ;;  %vm34_vm0 = vcmask 130048   ;;  %vm301_vm1 = vmmov 0   ;;  %s365_s0 = inlined_call_operand.vmem [shape: f32[8,32], index: 0, kind: input, shape index: {}]   ;;  %s366_s1 = inlined_call_operand.vmem [shape: f32[8,16], index: 1, kind: input, shape index: {}]   ;;  %s367_s2 = inlined_call_operand.vmem [shape: bf16[128,32], index: 2, kind: input, shape index: {}]   ;;  %s368_s3 = inlined_call_operand.vmem [shape: bf16[16,32], index: 3, kind: input, shape index: {}]   ;;  %s369_s4 = inlined_call_operand.hbm [shape: f32[8,128], index: 4, kind: output, shape index: {}]  }
   0x1   :  { %v269_v0 = vld [vmem:[%s368_s3] sm:$0xff]   ;;  %239 = vmatprep.subr.bf16.mxu0 %v300_v1  ;;  %23 = vst [vmem:[#allocation2] sm:$0xff] %v300_v1  ;;  %245 = vmatprep.subr.bf16.mxu1 %v300_v1  ;;  %v270_v3 = vld [vmem:[%s367_s2 + $0x38] sm:$0xff]   ;;  %v271_v5 = vld [vmem:[%s367_s2 + $0x30] sm:$0xff]  }
   0x2   :  { %v24_v2 = vld [vmem:[%s366_s1] sm:$0xff]  ;;  %240 = vmatpush3.bf16.msra.mxu0 %v269_v0  ;;  %241 = vmatprep.mubr.msk.bf16.mxu0 %vm301_vm1, %v300_v1  ;;  %v272_v6 = vld [vmem:[%s367_s2 + $0x28] sm:$0xff]  }
   0x3   :  { %v25_v4 = vpack.c.bf16 %v24_v2, %v24_v2  ;;  %246 = vmatpush3.bf16.msra.mxu1 %v270_v3  ;;  %261 = vmatprep.mubr.msk.bf16.mxu1 %vm301_vm1, %v300_v1 }
   0x4   :  { %247 = vmatprep.subr.bf16.mxu1 %v300_v1 }
   0x5   :  { %242 = vmatmul.mubr.msk.bf16.vlgmr.msra.gmra.mxu0 %vm34_vm0, %v25_v4 }
   0x7   :  { %248 = vmatpush3.bf16.msra.mxu1 %v271_v5 }
   0x8   :  { %249 = vmatprep.subr.bf16.mxu1 %v300_v1 }
   0x9   :  { %9 = vsyncpa [#allocation3], 0  ;;  %v273_v7 = vld [vmem:[%s367_s2 + $0x20] sm:$0xff]   ;;  %v274_v8 = vld [vmem:[%s367_s2 + $0x18] sm:$0xff]   ;;  %v85_v10 = vlaneseq  ;;  %s302_s9 = smov 32   ;;  %vm82_vm4 = vcmask 523520  }
   0xa   :  { %v275_v9 = vld [vmem:[%s367_s2 + $0x10] sm:$0xff]   ;;  %v276_v11 = vld [vmem:[%s367_s2 + $0x8] sm:$0xff]   ;;  %v277_v13 = vld [vmem:[%s367_s2] sm:$0xff]   ;;  %vm199_vm5 = vcmask 261120  }
   0xb   :  { %250 = vmatpush3.bf16.msra.mxu1 %v272_v6  ;;  %v86_v12 = vand.u32 127, %v85_v10  ;;  %v90_v14 = vld [vmem:[%s365_s0] sm:$0xff]  ;;  %s303_s0 = smov [#allocation2]  }
   0xc   :  { %251 = vmatprep.subr.bf16.mxu1 %v300_v1  ;;  %v226_v15 = vpack.c.bf16 %v90_v14, %v90_v14  ;;  %s207_s2 = sshll.u32 %s303_s0, 4  ;;  %s208_s2 = int_to_ptr.vmem [resolvable:$true] %s207_s2 }
   0xd   :  { %vm89_vm2 = vcmp.lt.s32.totalorder %v86_v12, 32  ;;  %s278_s10 = scalar_lea.vmem %s208_s2, 128  ;;  %p283_p1 = scmp.lt.s32.totalorder %s208_s2, %s208_s2 }
   0xe   :  { %vm225_vm3 = vmpackc.low %vm89_vm2, %vm89_vm2  ;;  %p279_p0 = scmp.ne.s32.totalorder %s208_s2, %s278_s10  ;;  %p284_p2 = scmp.lt.s32.totalorder %s278_s10, %s278_s10 }
   0xf   :  { %252 = vmatpush3.bf16.msra.mxu1 %v273_v7 }
  0x10   :  { %253 = vmatprep.subr.bf16.mxu1 %v300_v1  ;;  %p285_p3 = por %p284_p2, %p283_p1 }
  0x12   :  { %p286_p4 = pnand %p285_p3, %p279_p0 }
  0x13   :  { %254 = vmatpush3.bf16.msra.mxu1 %v274_v8 }
  0x14   :  { %255 = vmatprep.subr.bf16.mxu1 %v300_v1 }
  0x17   :  { %256 = vmatpush3.bf16.msra.mxu1 %v275_v9 }
  0x18   :  { %257 = vmatprep.subr.bf16.mxu1 %v300_v1 }
  0x1b   :  { %258 = vmatpush3.bf16.msra.mxu1 %v276_v11 }
  0x1c   :  { %259 = vmatprep.subr.bf16.mxu1 %v300_v1 }
  0x1f   :  { %260 = vmatpush3.bf16.msra.mxu1 %v277_v13 }
  0x22   :  { %262 = vmatmul.mubr.msk.bf16.vlgmr.msra.gmra.mxu1 %vm225_vm3, %v226_v15 }
  0xc5   :  { %v72_v16 = vpop.f32.mrf.mxu0 }
  0xc6   :  { %79 = vrot.lane.b32.xlu0 %v72_v16, %s302_s9 }
  0xc7   :  { %v243_v17 = vpop.f32.mrf.mxu0 }
  0xc9   :  { %v75_v18 = vpop.f32.mrf.mxu0 }
  0xcb   :  { %v244_v19 = vpop.f32.mrf.mxu0 }
  0xe2   :  { %v192_v20 = vpop.f32.mrf.mxu1 }
  0xe4   :  { %v263_v21 = vpop.f32.mrf.mxu1 }
  0xe6   :  { %v195_v22 = vpop.f32.mrf.mxu1 }
  0xe8   :  { %v264_v23 = vpop.f32.mrf.mxu1 }
 0x138   :  { %v80_v24 = vpop.permute.xlu0 %79 }
 0x139   :  { %83 = vst.msk [vmem:[#allocation2] sm:$0xff] %vm82_vm4, %v80_v24 }
 0x140   :  { %v93_v25 = vld [vmem:[#allocation2] sm:$0xff] }
 0x141   :  { %v198_v26 = vadd.f32 %v192_v20, %v93_v25 }
 0x143   :  { %200 = vst.msk [vmem:[#allocation2] sm:$0xff] %vm199_vm5, %v198_v26 }
 0x144   :  { %289 = shalt.err (!%p286_p4)
}
 0x145   :  { %210 = dma.vmem_to_hbm [thread:$0]  %s208_s2, 128, %s369_s4, [#allocation3]  }
 0x146   :  { %298 = dma.done.wait [#allocation3], 128  }
 0x147   :  { %299 = vsyncadd [#allocation3], 4294967168 }
 0x148   :  { %214 = vsyncpa [#allocation3], 1 }

</bundles_post_ra>
